<compile_context>
chip_gen: v7x
topology: tpu7x:2x2x1
jax: 0.10.0
libtpu: 0.0.40
codegen_flags: <defaults>
</compile_context>

<pallas_src>
import math

import numpy as np

import jax
import jax.numpy as jnp
from jax import image as jax_image
from jax.experimental import pallas as pl
from jax.experimental.pallas import tpu as pltpu


# --------------------------------------------------------------------------
# 1-D linear interpolation matrix matching torch.nn.Upsample(mode='trilinear',
# align_corners=False) along a single axis (row-stochastic, <=2 taps per row).
# --------------------------------------------------------------------------
def _linear_interp_matrix(out_size: int, in_size: int) -> np.ndarray:
    if out_size == in_size:
        return np.eye(in_size, dtype=np.float32)
    scale = in_size / out_size
    dst = np.arange(out_size, dtype=np.float64)
    src = (dst + 0.5) * scale - 0.5
    src = np.maximum(src, 0.0)                      # PyTorch clamps negative coords
    i0 = np.minimum(np.floor(src).astype(np.int64), in_size - 1)
    frac = src - np.floor(src)
    i1 = np.minimum(i0 + 1, in_size - 1)
    mat = np.zeros((out_size, in_size), dtype=np.float64)
    rows = np.arange(out_size)
    mat[rows, i0] += 1.0 - frac
    mat[rows, i1] += frac                           # i0 == i1 at the top edge -> weights add to 1
    return mat.astype(np.float32)


# --------------------------------------------------------------------------
# Fused Pallas kernel: per batch element n
#   t   = x[n]  (Cin*D, H*W)   @ K_hw^T (H*W, Ho*Wo)     # H,W interpolation
#   out = G     (Cout*Do,Cin*D) @ t      (Cin*D, Ho*Wo)   # conv + depth interp
#   out += bias (broadcast per output channel)
# Both matmul outputs are Ho*Wo = 256 lanes wide -> lane-dense, unmasked stores.
# --------------------------------------------------------------------------
def _fused_dsv_kernel(x_ref, khwt_ref, g_ref, b_ref, out_ref):
    # x_ref: (Cin*D, H*W)  khwt_ref: (H*W, Ho*Wo)  g_ref: (Cout*Do, Cin*D)
    # b_ref: (Cout*Do, 1)  out_ref: (Cout*Do, Ho*Wo)
    t = jnp.dot(x_ref[...], khwt_ref[...], preferred_element_type=jnp.float32)
    z = jnp.dot(g_ref[...], t, preferred_element_type=jnp.float32)
    out_ref[...] = (z + b_ref[...]).astype(out_ref.dtype)


# --------------------------------------------------------------------------
# Wrapper: UnetDsv3.forward
# --------------------------------------------------------------------------
def unet_dsv3_forward(x, weight, bias, scale_factor):
    N, Cin, D, H, W = x.shape
    Cout = weight.shape[0]
    Do = int(math.floor(D * scale_factor))
    Ho = int(math.floor(H * scale_factor))
    Wo = int(math.floor(W * scale_factor))
    HW, HoWo = H * W, Ho * Wo
    CinD, CoutDo = Cin * D, Cout * Do

    # Contiguous metadata reshape of NCDHW: row index c*D + d, col index h*W + w.
    x32 = x.astype(jnp.float32).reshape(N, CinD, HW)
    wc = weight.reshape(Cout, Cin).astype(jnp.float32)

    # Interpolation operators (built once, host-side numpy constants).
    a_d = _linear_interp_matrix(Do, D)                               # (Do, D)
    a_h = _linear_interp_matrix(Ho, H)
    a_w = _linear_interp_matrix(Wo, W)
    k_hw_t = jnp.asarray(np.kron(a_h, a_w).T)                        # (H*W, Ho*Wo)

    # Fused conv + depth-interp operator: G[o*Do+do, c*D+d] = Wc[o,c] * A_d[do,d].
    g = jnp.kron(wc, jnp.asarray(a_d))                               # (Cout*Do, Cin*D)
    # Bias folded into the final result (exact: A_d, A_h, A_w rows sum to 1).
    b_full = jnp.repeat(bias.astype(jnp.float32), Do).reshape(CoutDo, 1)

    cost = pl.CostEstimate(
        flops=2 * N * (CinD * HW * HoWo + CoutDo * CinD * HoWo),
        transcendentals=0,
        bytes_accessed=4 * (N * CinD * HW + HW * HoWo + CoutDo * CinD
                            + CoutDo + N * CoutDo * HoWo),
    )

    out = pl.pallas_call(
        _fused_dsv_kernel,
        out_shape=jax.ShapeDtypeStruct((N, CoutDo, HoWo), jnp.float32),
        grid=(N,),
        in_specs=[
            pl.BlockSpec((None, CinD, HW), lambda n: (n, 0, 0)),     # x[n] -> (Cin*D, H*W)
            pl.BlockSpec((HW, HoWo), lambda n: (0, 0)),              # K_hw^T (resident)
            pl.BlockSpec((CoutDo, CinD), lambda n: (0, 0)),          # G      (resident)
            pl.BlockSpec((CoutDo, 1), lambda n: (0, 0)),             # bias   (resident)
        ],
        out_specs=pl.BlockSpec((None, CoutDo, HoWo), lambda n: (n, 0, 0)),
        compiler_params=pltpu.CompilerParams(
            dimension_semantics=("parallel",),        # v7x: one batch element per TC
            vmem_limit_bytes=32 * 1024 * 1024,        # default scoped limit; ample headroom
        ),
        cost_estimate=cost,
    )(x32, k_hw_t, g, b_full)

    # Row index o*Do+do, col index ho*Wo+wo -> contiguous reshape to NCDHW.
    return out.reshape(N, Cout, Do, Ho, Wo)


# --------------------------------------------------------------------------
# Pure-JAX reference (Conv3d 1x1x1 + trilinear upsample, align_corners=False)
# --------------------------------------------------------------------------
def _reference(x, weight, bias, scale_factor):
    Cout, Cin = weight.shape[0], weight.shape[1]
    wc = weight.reshape(Cout, Cin).astype(jnp.float32)
    y = jnp.einsum('ncdhw,oc->nodhw', x.astype(jnp.float32), wc,
                   precision=jax.lax.Precision.HIGHEST)
    y = y + bias.reshape(1, -1, 1, 1, 1).astype(jnp.float32)
    n, co, d, h, w = y.shape
    out_shape = (n, co,
                 int(math.floor(d * scale_factor)),
                 int(math.floor(h * scale_factor)),
                 int(math.floor(w * scale_factor)))
    # jax.image.resize 'trilinear' uses half-pixel centers == PyTorch align_corners=False
    return jax_image.resize(y, out_shape, method='trilinear')


if __name__ == "__main__":
    # UnetDsv3(in_size=8, out_size=4, scale_factor=2) on a small 3D volume.
    N, Cin, Cout = 2, 8, 4
    D = H = W = 8
    scale_factor = 2

    key = jax.random.PRNGKey(0)
    kx, kw, kb = jax.random.split(key, 3)
    x = jax.random.normal(kx, (N, Cin, D, H, W), dtype=jnp.float32)
    weight = jax.random.normal(kw, (Cout, Cin, 1, 1, 1), dtype=jnp.float32) * 0.1
    bias = jax.random.normal(kb, (Cout,), dtype=jnp.float32) * 0.1

    out = unet_dsv3_forward(x, weight, bias, scale_factor)
    out = jax.block_until_ready(out)

    ref = _reference(x, weight, bias, scale_factor)
    assert out.shape == (N, Cout, D * scale_factor, H * scale_factor, W * scale_factor), out.shape
    max_err = jnp.max(jnp.abs(out - ref))
    assert jnp.allclose(out, ref, atol=1e-3, rtol=1e-3), f"max abs err = {max_err}"
    print("KERNEL_OK")
</pallas_src>

<mosaic_0001>
module attributes {stable_mosaic.version = 11 : i64} {
  func.func @_fused_dsv_kernel(%arg0: i32, %arg1: memref<1x64x64xf32, #tpu.memory_space<vmem>>, %arg2: memref<64x256xf32, #tpu.memory_space<vmem>>, %arg3: memref<64x64xf32, #tpu.memory_space<vmem>>, %arg4: memref<64x1xf32, #tpu.memory_space<vmem>>, %arg5: memref<1x64x256xf32, #tpu.memory_space<vmem>>) attributes {dimension_semantics = [#tpu.dimension_semantics<parallel>], iteration_bounds = array<i64: 2>, scalar_prefetch = 0 : i64, scratch_operands = 0 : i64, tpu.core_type = #tpu.core_type<tc>, window_params = [{transform_indices = @transform_0, window_bounds = array<i64: 1, 64, 64>}, {pipeline_mode = #tpu.pipeline_mode<synchronous>, transform_indices = @transform_1, window_bounds = array<i64: 64, 256>}, {pipeline_mode = #tpu.pipeline_mode<synchronous>, transform_indices = @transform_2, window_bounds = array<i64: 64, 64>}, {pipeline_mode = #tpu.pipeline_mode<synchronous>, transform_indices = @transform_3, window_bounds = array<i64: 64, 1>}, {transform_indices = @transform_4, window_bounds = array<i64: 1, 64, 256>}]} {
    %c0 = arith.constant 0 : index
    %c0_0 = arith.constant 0 : index
    %c0_1 = arith.constant 0 : index
    %0 = vector.load %arg1[%c0, %c0_0, %c0_1] : memref<1x64x64xf32, #tpu.memory_space<vmem>>, vector<1x64x64xf32>
    %1 = vector.shape_cast %0 : vector<1x64x64xf32> to vector<64x64xf32>
    %c0_2 = arith.constant 0 : index
    %c0_3 = arith.constant 0 : index
    %2 = vector.load %arg2[%c0_2, %c0_3] : memref<64x256xf32, #tpu.memory_space<vmem>>, vector<64x256xf32>
    %cst = arith.constant dense<0.000000e+00> : vector<64x256xf32>
    %3 = tpu.matmul %1, %2, %cst {dimension_numbers = #tpu.dot_dimension_numbers<[1], [0], [0], [1], [0, 0, 1, 1], [], []>} : vector<64x64xf32>, vector<64x256xf32>, vector<64x256xf32> -> vector<64x256xf32>
    %c0_4 = arith.constant 0 : index
    %c0_5 = arith.constant 0 : index
    %4 = vector.load %arg3[%c0_4, %c0_5] : memref<64x64xf32, #tpu.memory_space<vmem>>, vector<64x64xf32>
    %cst_6 = arith.constant dense<0.000000e+00> : vector<64x256xf32>
    %5 = tpu.matmul %4, %3, %cst_6 {dimension_numbers = #tpu.dot_dimension_numbers<[1], [0], [0], [1], [0, 0, 1, 1], [], []>} : vector<64x64xf32>, vector<64x256xf32>, vector<64x256xf32> -> vector<64x256xf32>
    %c0_7 = arith.constant 0 : index
    %c0_8 = arith.constant 0 : index
    %6 = vector.load %arg4[%c0_7, %c0_8] : memref<64x1xf32, #tpu.memory_space<vmem>>, vector<64x1xf32>
    %7 = vector.broadcast %6 : vector<64x1xf32> to vector<64x256xf32>
    %8 = arith.addf %5, %7 : vector<64x256xf32>
    %c0_9 = arith.constant 0 : index
    %c0_10 = arith.constant 0 : index
    %c0_11 = arith.constant 0 : index
    %9 = vector.load %arg5[%c0_9, %c0_10, %c0_11] : memref<1x64x256xf32, #tpu.memory_space<vmem>>, vector<1x64x256xf32>
    %10 = vector.shape_cast %9 : vector<1x64x256xf32> to vector<64x256xf32>
    %11 = vector.shape_cast %8 : vector<64x256xf32> to vector<1x64x256xf32>
    tpu.vector_store %arg5[%c0_9, %c0_10, %c0_11], %11 {strides = array<i32>} : memref<1x64x256xf32, #tpu.memory_space<vmem>>, vector<1x64x256xf32>,
    return
  }
  func.func @transform_0(%arg0: i32) -> (i32, i32, i32) {
    %c0_i32 = arith.constant 0 : i32
    %c0_i32_0 = arith.constant 0 : i32
    %c0_i32_1 = arith.constant 0 : i32
    return %arg0, %c0_i32, %c0_i32_0 : i32, i32, i32
  }
  func.func @transform_1(%arg0: i32) -> (i32, i32) {
    %c0_i32 = arith.constant 0 : i32
    %c0_i32_0 = arith.constant 0 : i32
    %c0_i32_1 = arith.constant 0 : i32
    return %c0_i32, %c0_i32_0 : i32, i32
  }
  func.func @transform_2(%arg0: i32) -> (i32, i32) {
    %c0_i32 = arith.constant 0 : i32
    %c0_i32_0 = arith.constant 0 : i32
    %c0_i32_1 = arith.constant 0 : i32
    return %c0_i32, %c0_i32_0 : i32, i32
  }
  func.func @transform_3(%arg0: i32) -> (i32, i32) {
    %c0_i32 = arith.constant 0 : i32
    %c0_i32_0 = arith.constant 0 : i32
    %c0_i32_1 = arith.constant 0 : i32
    return %c0_i32, %c0_i32_0 : i32, i32
  }
  func.func @transform_4(%arg0: i32) -> (i32, i32, i32) {
    %c0_i32 = arith.constant 0 : i32
    %c0_i32_0 = arith.constant 0 : i32
    %c0_i32_1 = arith.constant 0 : i32
    return %arg0, %c0_i32, %c0_i32_0 : i32, i32, i32
  }
}

</mosaic_0001>

<bundles_post_ra>
// kernel: tpu_custom_call.1
= control target key start
LH: loop header
LB: loop body
LE: loop exit
PB: predicated region body
PF: predicated region fallthrough
CT: control target
= control target key end

     0   :  { %9 = vsyncpa [#allocation3], 0  ;;  %s1309_s0 = inlined_call_operand.hbm [shape: f32[2,64,64], index: 0, kind: input, shape index: {}]   ;;  %s1310_s1 = inlined_call_operand.hbm [shape: f32[64,256], index: 1, kind: input, shape index: {}]   ;;  %s1311_s2 = inlined_call_operand.vmem [shape: f32[64,64], index: 2, kind: input, shape index: {}]   ;;  %s1312_s3 = inlined_call_operand.vmem [shape: f32[64,1], index: 3, kind: input, shape index: {}]   ;;  %s1313_s4 = inlined_call_operand.hbm [shape: f32[2,64,256], index: 4, kind: output, shape index: {}]  }
   0x1   :  { %11 = vsyncpa [#allocation3 + $0x1], 0 }
   0x2   :  { %12 = vsyncpa [#allocation6], 0 }
   0x3   :  { %13 = vsyncpa [#allocation4], 0 }
   0x4   :  { %15 = vsyncpa [#allocation4 + $0x1], 0  ;;  %s998_s15 = smov 0   ;;  %s1000_s16 = smov 0  }
   0x5   :  { %s1002_s17 = smov 0   ;;  %s1004_s18 = smov 0  }
   0x6 LB: > { %s1019_s19 = sadd.s32 4294967295, %s960_s18   ;;  %s699_s20 = sadd.s32 4294967294, %s960_s18   ;;  %s960_s18 = sphi %s1004_s18, %s1333_s18   ;;  %s956_s17 = sphi %s1002_s17, %s1332_s17   ;;  %s952_s16 = sphi %s1000_s16, %s1331_s16   ;;  %s948_s15 = sphi %s998_s15, %s1330_s15  }
   0x7   : > { %p41_p0 = scmp.ne.s32.totalorder %s952_s16, %s948_s15  ;;  %p1314_p1 = scmp.eq.s32.totalorder %s1019_s19, 0 }
   0x8   : > { %p134_p3 = scmp.eq.s32.totalorder %s699_s20, 1  ;;  %p700_p5 = scmp.ge.s32.totalorder %s960_s18, 1 }
   0x9   : > { %p1028_p4 = por %p1314_p1, %p41_p0  ;;  %p141_p7 = scmp.lt.s32.totalorder %s960_s18, 3 }
   0xa   : > { %p1033_p6 = por %p134_p3, %p41_p0  ;;  %s962_s24 = smov [#allocation5]  }
   0xb   : > { %s1317_s21 = scalar_select %p1028_p4, 1, 0 }
   0xc   : > { %s1318_s22 = scalar_select %p1033_p6, 1, 0 }
   0xd   : > { %p1038_p8 = pnand %p700_p5, %p141_p7  ;;  %s153_s25 = sshll.u32 %s962_s24, 4  ;;  %s1042_s25 = int_to_ptr.vmem [resolvable:$true] %s153_s25 }
   0xe   : > { %s1054_s27 = sadd.s32 1, %s960_s18   ;;  %s28_s28 = sadd.s32 1, %s956_s17 }
   0xf   : > { %s1319_s23 = scalar_select %p1038_p8, 1, 0 }
  0x10   : > { %p773_p9 = pneg %p1038_p8  ;;  %s25_s29 = ssub.s32 %s960_s18, %s1054_s27 }
  0x11   : > { %s832_s6 = scalar_lea.hbm %s1310_s1, 2048 }
  0x12   : > { %p1049_p11 = pnand %p773_p9, %p1314_p1  ;;  %p833_p12 = scmp.ne.s32.totalorder %s1310_s1, %s832_s6 }
  0x13   : > { %p839_p5 = scmp.lt.u32.totalorder %s832_s6, %s1310_s1 }
  0x14   : > { %p834_p13 = pneg %p1049_p11 }
  0x16   : > { %p835_p0 = pnand %p834_p13, %p833_p12 }
  0x18   : > { %p836_p3 = pneg %p835_p0 }
  0x1a   : > { %p841_p7 = pnand %p839_p5, %p836_p3 }
  0x1c   : > { %844 = shalt.err (!%p841_p7)
}
  0x1d   : > { %s845_s11 = scalar_lea.vmem %s1042_s25, 2048  ;;  %p853_p2 = scmp.lt.s32.totalorder %s1042_s25, %s1042_s25 }
  0x1e   : > { %p846_p9 = scmp.ne.s32.totalorder %s1042_s25, %s845_s11  ;;  %p854_p6 = scmp.lt.s32.totalorder %s845_s11, %s845_s11 }
  0x20   : > { %p848_p10 = pnand %p846_p9, %p834_p13  ;;  %p855_p4 = por %p854_p6, %p853_p2 }
  0x22   : > { %p849_p1 = pneg %p848_p10 }
  0x24   : > { %p856_p8 = pnand %p855_p4, %p849_p1 }
  0x26   : > { %859 = shalt.err (!%p856_p8)
}
  0x27   : > { %s963_s12 = smov 256   ;;  %s964_s13 = smov 16  }
  0x28   : > { %776 = dma.hbm_to_vmem [thread:$0]  (!%p1049_p11), %s1310_s1, 2048, %s1042_s25, [#allocation6], %s963_s12, %s963_s12, %s964_s13  }
  0x29   : > { %p26_p2 = scmp.eq.s32.totalorder %s25_s29, 0  ;;  %p35_p1 = scmp.ne.s32.totalorder %s956_s17, %s952_s16 }
  0x2a   : > { %p36_p4 = scmp.eq.s32.totalorder %s960_s18, 0  ;;  %p786_p6 = scmp.lt.s32.totalorder %s960_s18, 2 }
  0x2b   : > { %s1085_s24 = scalar_select %p26_p2, %s956_s17, %s28_s28  }
  0x2c   : > { %p37_p8 = por %p36_p4, %p35_p1  ;;  %p1321_p10 = scmp.eq.s32.totalorder %s1019_s19, 1 }
  0x2d   : > { %s173_s5 = sand.u32 1, %s956_s17   ;;  %s731_s6 = sshll.u32 %s960_s18, 10 }
  0x2e   : > { %p1089_p12 = por %p1321_p10, %p35_p1  ;;  %s703_s7 = sshll.u32 %s173_s5, 6 }
  0x2f   : > { %s1098_s9 = scalar_lea.hbm %s1309_s0, %s731_s6  ;;  %s177_s25 = scalar_lea.vmem [#allocation2], %s703_s7 }
  0x30   : > { %s184_s28 = sshll.u32 %s177_s25, 4  ;;  %p1100_p11 = pnand %p786_p6, %p37_p8  ;;  %s1104_s28 = int_to_ptr.vmem [resolvable:$true] %s184_s28 }
  0x31   : > { %s1106_s10 = scalar_lea.sflag [#allocation3], %s173_s5  ;;  %s860_s11 = scalar_lea.hbm %s1098_s9, 1024 }
  0x32   : > { %p861_p13 = scmp.ne.s32.totalorder %s1098_s9, %s860_s11  ;;  %p862_p0 = pneg %p1100_p11 }
  0x33   : > { %s865_s14 = scalar_lea.hbm %s1309_s0, 2048  ;;  %p866_p7 = scmp.lt.u32.totalorder %s1098_s9, %s1309_s0 }
  0x34   : > { %p863_p3 = pnand %p862_p0, %p861_p13  ;;  %p867_p9 = scmp.lt.u32.totalorder %s865_s14, %s860_s11 }
  0x35   : > { %p869_p1 = scmp.lt.u32.totalorder %s860_s11, %s1098_s9 }
  0x36   : > { %p864_p5 = pneg %p863_p3  ;;  %p868_p2 = por %p867_p9, %p866_p7 }
  0x38   : > { %p870_p4 = por %p869_p1, %p868_p2 }
  0x3a   : > { %p871_p6 = pnand %p870_p4, %p864_p5 }
  0x3c   : > { %874 = shalt.err (!%p871_p6)
}
  0x3d   : > { %s875_s5 = scalar_lea.vmem %s1104_s28, 1024  ;;  %s965_s7 = smov [#allocation2]  }
  0x3e   : > { %p876_p8 = scmp.ne.s32.totalorder %s1104_s28, %s875_s5  ;;  %s880_s26 = sshll.u32 %s965_s7, 4  ;;  %s881_s26 = int_to_ptr.vmem [resolvable:$false] %s880_s26 }
  0x3f   : > { %s882_s8 = scalar_lea.vmem %s881_s26, 2048  ;;  %p883_p3 = scmp.lt.s32.totalorder %s1104_s28, %s881_s26 }
  0x40   : > { %p878_p10 = pnand %p876_p8, %p862_p0  ;;  %p884_p7 = scmp.lt.s32.totalorder %s882_s8, %s875_s5 }
  0x42   : > { %p879_p13 = pneg %p878_p10  ;;  %p885_p9 = por %p884_p7, %p883_p3 }
  0x44   : > { %p886_p2 = pnand %p885_p9, %p879_p13 }
  0x46   : > { %889 = shalt.err (!%p886_p2)
}
  0x47   : > { %s966_s25 = smov 128   ;;  %s967_s11 = smov 8  }
  0x48   : > { %780 = dma.hbm_to_vmem [thread:$0]  (!%p1100_p11), %s1098_s9, 1024, %s1104_s28, %s1106_s10, %s966_s25, %s966_s25, %s967_s11  }
  0x49   : > { %p1324_p0 = scmp.ne.s32.totalorder %s1319_s23, 0 }
  0x4a   : > { %s1137_s12 = sand.u32 (!%p1324_p0), 1, %s952_s16   ;;  %p1325_p5 = scmp.ne.s32.totalorder (!%p1324_p0), %s1317_s21, 0 }
  0x4b   : > { %196 = sbr.rel (%p1324_p0) target bundleno = 610 (0x262), region = 36  ;;  %s707_s13 = sshll.u32 (!%p1324_p0), %s1137_s12, 6 }
  0x4c   : > { %s199_s14 = scalar_lea.sflag (!%p1324_p0), [#allocation3], %s1137_s12  ;;  %s1141_s20 = scalar_lea.vmem (!%p1324_p0), [#allocation2], %s707_s13 }
  0x52   : > { %935 = dma.done.wait (%p1325_p5), %s199_s14, 1024  }
  0x53   : > { %937 = vsyncadd (%p1325_p5), %s199_s14, 4294966272  ;;  %p1326_p11 = scmp.eq.s32.totalorder %s1019_s19, 0 }
  0x55   : > { %939 = dma.done.wait (%p1326_p11), [#allocation6], 2048   ;;  %p1327_p1 = pmov %p1326_p11 }
  0x56   : > { %v968_v0 = vmov 0.0   ;;  %v240_v1 = vld [vmem:[#allocation5 + $0x8] sm:$0xff]  ;;  %v242_v2 = vld [vmem:[#allocation5 + $0x18] sm:$0xff]  ;;  %v239_v3 = vld [vmem:[#allocation5] sm:$0xff]  ;;  %vm255_vm0 = vcmask 523264   ;;  %v969_v35 = vmov 0  }
  0x57   : > { %941 = vsyncadd (%p1327_p1), [#allocation6], 4294965248  ;;  %344 = vmatprep.mubr.f32.mxu0 %v968_v0  ;;  %537 = vmatprep.mubr.f32.mxu1 %v968_v0  ;;  %v733_v4 = vpack.c.bf16 %v242_v2, %v240_v1  ;;  %v241_v5 = vld [vmem:[#allocation5 + $0x10] sm:$0xff]  ;;  %v244_v6 = vld [vmem:[#allocation5 + $0x28] sm:$0xff]  ;;  %s709_s21 = sshll.u32 %s1137_s12, 7  ;;  %s732_s9 = sshll.u32 %s1019_s19, 11 }
  0x58   : > { %v246_v7 = vld [vmem:[#allocation5 + $0x38] sm:$0xff]  ;;  %v735_v8 = vpack.c.bf16 %v241_v5, %v239_v3  ;;  %v243_v10 = vld [vmem:[#allocation5 + $0x20] sm:$0xff]  ;;  %v245_v11 = vld [vmem:[#allocation5 + $0x30] sm:$0xff]  ;;  %830 = vset.pattern.permute.xlu0 %v969_v35  ;;  %831 = vset.pattern.permute.xlu1 %v969_v35  ;;  %s1240_s23 = scalar_lea.vmem [#allocation7], %s709_s21  ;;  %s1261_s6 = scalar_lea.hbm %s1313_s4, %s732_s9 }
  0x59   : > { %v737_v9 = vpack.c.bf16 %v246_v7, %v244_v6  ;;  %v248_v12 = vld [vmem:[#allocation5 + $0x48] sm:$0xff]  ;;  %734 = vmatprep.subr.bf16.mxu0 %v733_v4  ;;  %v250_v13 = vld [vmem:[#allocation5 + $0x58] sm:$0xff]  ;;  %v739_v14 = vpack.c.bf16 %v245_v11, %v243_v10  ;;  %v247_v16 = vld [vmem:[#allocation5 + $0x40] sm:$0xff]  ;;  %s616_s28 = sshll.u32 %s1240_s23, 4  ;;  %s603_s19 = scalar_lea.sflag [#allocation4], %s1137_s12  ;;  %s1263_s28 = int_to_ptr.vmem [resolvable:$true] %s616_s28 }
  0x5a   : > { %736 = vmatpush1.bf16.msra.mxu0 %v735_v8  ;;  %v741_v15 = vpack.c.bf16 %v250_v13, %v248_v12  ;;  %v249_v17 = vld [vmem:[#allocation5 + $0x50] sm:$0xff]  ;;  %v252_v18 = vld [vmem:[#allocation5 + $0x68] sm:$0xff]  ;;  %v254_v19 = vld [vmem:[#allocation5 + $0x78] sm:$0xff]  ;;  %s890_s5 = scalar_lea.vmem %s1263_s28, 2048  ;;  %s970_s7 = smov [#allocation7]  }
  0x5b   : > { %738 = vmatprep.subr.bf16.mxu0 %v737_v9  ;;  %v743_v20 = vpack.c.bf16 %v249_v17, %v247_v16  ;;  %v745_v21 = vpack.c.bf16 %v254_v19, %v252_v18  ;;  %v251_v22 = vld [vmem:[#allocation5 + $0x60] sm:$0xff]  ;;  %v253_v23 = vld [vmem:[#allocation5 + $0x70] sm:$0xff]  ;;  %v232_v26 = vld [vmem:[%s1141_s20 + $0x8] sm:$0xff]  ;;  %p891_p4 = scmp.ne.s32.totalorder %s1263_s28, %s890_s5  ;;  %s894_s26 = sshll.u32 %s970_s7, 4  ;;  %s895_s26 = int_to_ptr.vmem [resolvable:$false] %s894_s26 }
  0x5c   : > { %v747_v24 = vpack.c.bf16 %v253_v23, %v251_v22  ;;  %v231_v25 = vld [vmem:[%s1141_s20] sm:$0xff]  ;;  %v233_v27 = vld [vmem:[%s1141_s20 + $0x10] sm:$0xff]  ;;  %v234_v28 = vld [vmem:[%s1141_s20 + $0x18] sm:$0xff]  ;;  %s896_s8 = scalar_lea.vmem %s895_s26, 4096  ;;  %p897_p10 = scmp.lt.s32.totalorder %s1263_s28, %s895_s26 }
  0x5d   : > { %v235_v29 = vld [vmem:[%s1141_s20 + $0x20] sm:$0xff]  ;;  %v236_v30 = vld [vmem:[%s1141_s20 + $0x28] sm:$0xff]  ;;  %v237_v31 = vld [vmem:[%s1141_s20 + $0x30] sm:$0xff]  ;;  %p892_p6 = pnand %p891_p4, %p1089_p12  ;;  %p898_p13 = scmp.lt.s32.totalorder %s896_s8, %s890_s5 }
  0x5e   : > { %740 = vmatpush1.bf16.msra.mxu0 %v739_v14  ;;  %v238_v32 = vld [vmem:[%s1141_s20 + $0x38] sm:$0xff]  ;;  %v401_v33 = vld [vmem:[%s1312_s3] sm:$0xff]  ;;  %v403_v34 = vld [vmem:[%s1312_s3 + $0x10] sm:$0xff] }
  0x5f   : > { %742 = vmatprep.subr.bf16.mxu0 %v741_v15  ;;  %411 = vperm.xlu0 %830, %v401_v33   ;;  %v402_v36 = vld [vmem:[%s1312_s3 + $0x8] sm:$0xff]  ;;  %v404_v37 = vld [vmem:[%s1312_s3 + $0x18] sm:$0xff]  ;;  %v405_v39 = vld [vmem:[%s1312_s3 + $0x20] sm:$0xff]  ;;  %p893_p8 = pneg %p892_p6  ;;  %p899_p3 = por %p898_p13, %p897_p10 }
  0x60   : > { %421 = vperm.xlu1 %831, %v403_v34   ;;  %v406_v38 = vld [vmem:[%s1312_s3 + $0x28] sm:$0xff]  ;;  %v408_v40 = vld [vmem:[%s1312_s3 + $0x38] sm:$0xff]  ;;  %v407_v41 = vld [vmem:[%s1312_s3 + $0x30] sm:$0xff] }
  0x61   : > { %v393_v3 = vld [vmem:[%s1311_s2] sm:$0xff]  ;;  %v394_v4 = vld [vmem:[%s1311_s2 + $0x8] sm:$0xff]  ;;  %v395_v5 = vld [vmem:[%s1311_s2 + $0x10] sm:$0xff]  ;;  %p900_p7 = pnand %p899_p3, %p893_p8 }
  0x62   : > { %744 = vmatpush1.bf16.msra.mxu0 %v743_v20  ;;  %v396_v6 = vld [vmem:[%s1311_s2 + $0x18] sm:$0xff]  ;;  %v397_v7 = vld [vmem:[%s1311_s2 + $0x20] sm:$0xff]  ;;  %v398_v8 = vld [vmem:[%s1311_s2 + $0x28] sm:$0xff] }
  0x63   : > { %746 = vmatprep.subr.bf16.mxu0 %v745_v21  ;;  %416 = vperm.xlu0 %830, %v402_v36   ;;  %v399_v9 = vld [vmem:[%s1311_s2 + $0x30] sm:$0xff]  ;;  %v400_v10 = vld [vmem:[%s1311_s2 + $0x38] sm:$0xff] }
  0x64   : > { %426 = vperm.xlu1 %831, %v404_v37  }
  0x66   : > { %748 = vmatpush1.bf16.msra.mxu0 %v747_v24 }
  0x67   : > { %431 = vperm.xlu0 %830, %v405_v39  }
  0x68   : > { %436 = vperm.xlu1 %831, %v406_v38  }
  0x69   : > { %710 = vmatmul.mubr.msk.f32.vlgmr.msra.gmra.mrb[0].mxu0 %vm255_vm0, %v231_v25 }
  0x6a   : > { %350 = vmatprep.mubr.f32.mxu0 %v968_v0 }
  0x6b   : > { %441 = vperm.xlu0 %830, %v407_v41  }
  0x6c   : > { %446 = vperm.xlu1 %831, %v408_v40  }
  0x6d   : > { %711 = vmatmul.mubr.msk.f32.gmra.mrb[2].mxu0 %vm255_vm0, %v232_v26 }
  0x6e   : > { %356 = vmatprep.mubr.f32.mxu0 %v968_v0 }
  0x71   : > { %712 = vmatmul.mubr.msk.f32.gmra.mrb[4].mxu0 %vm255_vm0, %v233_v27 }
  0x72   : > { %362 = vmatprep.mubr.f32.mxu0 %v968_v0 }
  0x75   : > { %713 = vmatmul.mubr.msk.f32.gmra.mrb[6].mxu0 %vm255_vm0, %v234_v28 }
  0x76   : > { %368 = vmatprep.mubr.f32.mxu0 %v968_v0 }
  0x79   : > { %714 = vmatmul.mubr.msk.f32.gmra.mrb[8].mxu0 %vm255_vm0, %v235_v29 }
  0x7a   : > { %374 = vmatprep.mubr.f32.mxu0 %v968_v0 }
  0x7d   : > { %715 = vmatmul.mubr.msk.f32.gmra.mrb[10].mxu0 %vm255_vm0, %v236_v30 }
  0x7e   : > { %380 = vmatprep.mubr.f32.mxu0 %v968_v0 }
  0x81   : > { %716 = vmatmul.mubr.msk.f32.gmra.mrb[12].mxu0 %vm255_vm0, %v237_v31 }
  0x82   : > { %386 = vmatprep.mubr.f32.mxu0 %v968_v0 }
  0x85   : > { %717 = vmatmul.mubr.msk.f32.gmra.mrb[14].mxu0 %vm255_vm0, %v238_v32 }
  0xde   : > { %v412_v11 = vpop.permute.xlu0 %411 }
  0xdf   : > { %v422_v19 = vpop.permute.xlu1 %421 }
  0xe2   : > { %v417_v16 = vpop.permute.xlu0 %416 }
  0xe3   : > { %v427_v25 = vpop.permute.xlu1 %426 }
  0xe6   : > { %v432_v30 = vpop.permute.xlu0 %431 }
  0xe7   : > { %v437_v35 = vpop.permute.xlu1 %436 }
  0xea   : > { %v442_v40 = vpop.permute.xlu0 %441 }
 0x13c   : > { %v346_v42 = vpop.f32.mrb[0].mxu0 }
 0x13d   : > { %v348_v43 = vpop.f32.mrb[1].mxu0 }
 0x140   : > { %v352_v44 = vpop.f32.mrb[2].mxu0 }
 0x141   : > { %v751_v45 = vpack.c.bf16 %v352_v44, %v346_v42  ;;  %v354_v46 = vpop.f32.mrb[3].mxu0 }
 0x142   : > { %v749_v47 = vpack.c.bf16 %v354_v46, %v348_v43 }
 0x144   : > { %v358_v48 = vpop.f32.mrb[4].mxu0  ;;  %750 = vmatprep.subr.bf16.mxu1 %v749_v47 }
 0x145   : > { %v360_v49 = vpop.f32.mrb[5].mxu0  ;;  %752 = vmatpush1.bf16.msra.mxu1 %v751_v45  ;;  %v447_v45 = vpop.permute.xlu1 %446 }
 0x148   : > { %v364_v50 = vpop.f32.mrb[6].mxu0 }
 0x149   : > { %v755_v51 = vpack.c.bf16 %v364_v50, %v358_v48  ;;  %v366_v52 = vpop.f32.mrb[7].mxu0 }
 0x14a   : > { %v753_v53 = vpack.c.bf16 %v366_v52, %v360_v49 }
 0x14c   : > { %v370_v54 = vpop.f32.mrb[8].mxu0  ;;  %754 = vmatprep.subr.bf16.mxu1 %v753_v53 }
 0x14d   : > { %v372_v55 = vpop.f32.mrb[9].mxu0  ;;  %756 = vmatpush1.bf16.msra.mxu1 %v755_v51 }
 0x150   : > { %v376_v56 = vpop.f32.mrb[10].mxu0 }
 0x151   : > { %v759_v57 = vpack.c.bf16 %v376_v56, %v370_v54  ;;  %v378_v58 = vpop.f32.mrb[11].mxu0 }
 0x152   : > { %v757_v59 = vpack.c.bf16 %v378_v58, %v372_v55 }
 0x154   : > { %v382_v60 = vpop.f32.mrb[12].mxu0  ;;  %758 = vmatprep.subr.bf16.mxu1 %v757_v59 }
 0x155   : > { %v384_v61 = vpop.f32.mrb[13].mxu0  ;;  %760 = vmatpush1.bf16.msra.mxu1 %v759_v57 }
 0x158   : > { %v388_v62 = vpop.f32.mrb[14].mxu0 }
 0x159   : > { %v763_v63 = vpack.c.bf16 %v388_v62, %v382_v60  ;;  %v390_v1 = vpop.f32.mrb[15].mxu0 }
 0x15a   : > { %v761_v2 = vpack.c.bf16 %v390_v1, %v384_v61 }
 0x15c   : > { %762 = vmatprep.subr.bf16.mxu1 %v761_v2 }
 0x15d   : > { %764 = vmatpush1.bf16.msra.mxu1 %v763_v63 }
 0x160   : > { %718 = vmatmul.mubr.msk.f32.vlgmr.msra.gmra.mrb[0].mxu1 %vm255_vm0, %v393_v3 }
 0x161   : > { %543 = vmatprep.mubr.f32.mxu1 %v968_v0 }
 0x164   : > { %719 = vmatmul.mubr.msk.f32.gmra.mrb[2].mxu1 %vm255_vm0, %v394_v4 }
 0x165   : > { %549 = vmatprep.mubr.f32.mxu1 %v968_v0 }
 0x168   : > { %720 = vmatmul.mubr.msk.f32.gmra.mrb[4].mxu1 %vm255_vm0, %v395_v5 }
 0x169   : > { %555 = vmatprep.mubr.f32.mxu1 %v968_v0 }
 0x16c   : > { %721 = vmatmul.mubr.msk.f32.gmra.mrb[6].mxu1 %vm255_vm0, %v396_v6 }
 0x16d   : > { %561 = vmatprep.mubr.f32.mxu1 %v968_v0 }
 0x170   : > { %722 = vmatmul.mubr.msk.f32.gmra.mrb[8].mxu1 %vm255_vm0, %v397_v7 }
 0x171   : > { %567 = vmatprep.mubr.f32.mxu1 %v968_v0 }
 0x174   : > { %723 = vmatmul.mubr.msk.f32.gmra.mrb[10].mxu1 %vm255_vm0, %v398_v8 }
 0x175   : > { %573 = vmatprep.mubr.f32.mxu1 %v968_v0 }
 0x178   : > { %724 = vmatmul.mubr.msk.f32.gmra.mrb[12].mxu1 %vm255_vm0, %v399_v9 }
 0x179   : > { %579 = vmatprep.mubr.f32.mxu1 %v968_v0 }
 0x17c   : > { %725 = vmatmul.mubr.msk.f32.gmra.mrb[14].mxu1 %vm255_vm0, %v400_v10 }
 0x233   : > { %v539_v12 = vpop.f32.mrb[0].mxu1 }
 0x234   : > { %v540_v13 = vadd.f32 %v539_v12, %v412_v11  ;;  %v541_v14 = vpop.f32.mrb[1].mxu1 }
 0x235   : > { %v542_v15 = vadd.f32 %v541_v14, %v412_v11 }
 0x236   : > { %586 = vst [vmem:[%s1240_s23] sm:$0xff] %v540_v13 }
 0x237   : > { %587 = vst [vmem:[%s1240_s23 + $0x8] sm:$0xff] %v542_v15  ;;  %v545_v0 = vpop.f32.mrb[2].mxu1 }
 0x238   : > { %v546_v17 = vadd.f32 %v545_v0, %v417_v16  ;;  %v547_v18 = vpop.f32.mrb[3].mxu1 }
 0x239   : > { %v548_v20 = vadd.f32 %v547_v18, %v417_v16 }
 0x23a   : > { %588 = vst [vmem:[%s1240_s23 + $0x10] sm:$0xff] %v546_v17 }
 0x23b   : > { %589 = vst [vmem:[%s1240_s23 + $0x18] sm:$0xff] %v548_v20  ;;  %v551_v21 = vpop.f32.mrb[4].mxu1 }
 0x23c   : > { %v552_v22 = vadd.f32 %v551_v21, %v422_v19  ;;  %v553_v23 = vpop.f32.mrb[5].mxu1 }
 0x23d   : > { %v554_v24 = vadd.f32 %v553_v23, %v422_v19 }
 0x23e   : > { %590 = vst [vmem:[%s1240_s23 + $0x20] sm:$0xff] %v552_v22 }
 0x23f   : > { %591 = vst [vmem:[%s1240_s23 + $0x28] sm:$0xff] %v554_v24  ;;  %v557_v26 = vpop.f32.mrb[6].mxu1 }
 0x240   : > { %v558_v27 = vadd.f32 %v557_v26, %v427_v25  ;;  %v559_v28 = vpop.f32.mrb[7].mxu1 }
 0x241   : > { %v560_v29 = vadd.f32 %v559_v28, %v427_v25 }
 0x242   : > { %592 = vst [vmem:[%s1240_s23 + $0x30] sm:$0xff] %v558_v27 }
 0x243   : > { %593 = vst [vmem:[%s1240_s23 + $0x38] sm:$0xff] %v560_v29  ;;  %v563_v31 = vpop.f32.mrb[8].mxu1 }
 0x244   : > { %v564_v32 = vadd.f32 %v563_v31, %v432_v30  ;;  %v565_v33 = vpop.f32.mrb[9].mxu1 }
 0x245   : > { %v566_v34 = vadd.f32 %v565_v33, %v432_v30 }
 0x246   : > { %594 = vst [vmem:[%s1240_s23 + $0x40] sm:$0xff] %v564_v32 }
 0x247   : > { %595 = vst [vmem:[%s1240_s23 + $0x48] sm:$0xff] %v566_v34  ;;  %v569_v36 = vpop.f32.mrb[10].mxu1 }
 0x248   : > { %v570_v37 = vadd.f32 %v569_v36, %v437_v35  ;;  %v571_v38 = vpop.f32.mrb[11].mxu1 }
 0x249   : > { %v572_v39 = vadd.f32 %v571_v38, %v437_v35 }
 0x24a   : > { %596 = vst [vmem:[%s1240_s23 + $0x50] sm:$0xff] %v570_v37 }
 0x24b   : > { %597 = vst [vmem:[%s1240_s23 + $0x58] sm:$0xff] %v572_v39  ;;  %v575_v41 = vpop.f32.mrb[12].mxu1 }
 0x24c   : > { %v576_v42 = vadd.f32 %v575_v41, %v442_v40  ;;  %v577_v43 = vpop.f32.mrb[13].mxu1 }
 0x24d   : > { %v578_v44 = vadd.f32 %v577_v43, %v442_v40 }
 0x24e   : > { %598 = vst [vmem:[%s1240_s23 + $0x60] sm:$0xff] %v576_v42 }
 0x24f   : > { %599 = vst [vmem:[%s1240_s23 + $0x68] sm:$0xff] %v578_v44  ;;  %v581_v46 = vpop.f32.mrb[14].mxu1 }
 0x250   : > { %v582_v47 = vadd.f32 %v581_v46, %v447_v45  ;;  %v583_v48 = vpop.f32.mrb[15].mxu1 }
 0x251   : > { %v584_v49 = vadd.f32 %v583_v48, %v447_v45 }
 0x252   : > { %600 = vst [vmem:[%s1240_s23 + $0x70] sm:$0xff] %v582_v47 }
 0x253   : > { %601 = vst [vmem:[%s1240_s23 + $0x78] sm:$0xff] %v584_v49 }
 0x254   : > { %903 = shalt.err (!%p900_p7)
}
 0x255   : > { %s904_s25 = scalar_lea.hbm %s1261_s6, 2048  ;;  %s908_s14 = scalar_lea.hbm %s1313_s4, 4096 }
 0x256   : > { %p905_p9 = scmp.ne.s32.totalorder %s1261_s6, %s904_s25  ;;  %p909_p5 = scmp.lt.u32.totalorder %s1261_s6, %s1313_s4 }
 0x257   : > { %p910_p11 = scmp.lt.u32.totalorder %s908_s14, %s904_s25  ;;  %p912_p4 = scmp.lt.u32.totalorder %s904_s25, %s1261_s6 }
 0x258   : > { %p906_p2 = pnand %p905_p9, %p1089_p12 }
 0x259   : > { %p911_p1 = por %p910_p11, %p909_p5 }
 0x25a   : > { %p907_p0 = pneg %p906_p2 }
 0x25b   : > { %p913_p6 = por %p912_p4, %p911_p1 }
 0x25d   : > { %p914_p8 = pnand %p913_p6, %p907_p0 }
 0x25f   : > { %917 = shalt.err (!%p914_p8)
}
 0x260   : > { %s971_s23 = smov 256   ;;  %s972_s9 = smov 16  }
 0x261   : > { %771 = dma.vmem_to_hbm [thread:$0]  (%p1089_p12), %s1263_s28, 2048, %s1261_s6, %s603_s19, %s971_s23, %s971_s23, %s972_s9  }
 0x262 PF: > { %s631_s29 = sand.u32 1, %s948_s15   ;;  %p1328_p10 = scmp.ne.s32.totalorder %s1318_s22, 0 }
 0x263   : > { %p1329_p13 = scmp.ge.s32.totalorder %s960_s18, 2  ;;  %s632_s10 = scalar_lea.sflag [#allocation4], %s631_s29 }
 0x265   : > { %p782_p3 = pnand %p1329_p13, %p1328_p10 }
 0x267   : > { %943 = dma.done.wait (!%p782_p3), %s632_s10, 2048  }
 0x268   : > { %945 = vsyncadd (!%p782_p3), %s632_s10, 4294965248  ;;  %p18_p7 = scmp.ge.s32.totalorder %s1054_s27, 4   ;;  %s1330_s15 = smov %s952_s16 }
 0x269   : > { %s1331_s16 = smov %s956_s17  ;;  %s1332_s17 = smov %s1085_s24 }
 0x26a   : > { %s1333_s18 = smov %s1054_s27  ;;  %20 = sbr.rel (!%p18_p7) target bundleno = 6 (0x6), region = 85 }
 0x271   :  { %637 = vsyncpa [#allocation3], 1 }
 0x272   :  { %639 = vsyncpa [#allocation3 + $0x1], 1 }
 0x273   :  { %640 = vsyncpa [#allocation6], 1 }
 0x274   :  { %641 = vsyncpa [#allocation4], 1 }
 0x275   :  { %643 = vsyncpa [#allocation4 + $0x1], 1 }

</bundles_post_ra>
